<compile_context>
chip_gen: v6e
topology: v6e:2x2x1
jax: 0.10.0
libtpu: 0.0.40
codegen_flags: <defaults>
</compile_context>

<pallas_src>
import functools

import numpy as np

import jax
import jax.numpy as jnp
from jax.experimental import pallas as pl
from jax.experimental.pallas import tpu as pltpu

# Finite stand-in for -inf when padding the max-pool input.  Every pooling
# window that survives the stride-3 subsample contains at least one real
# element for this geometry (asserted in forward()), so the result matches
# PyTorch's -inf padding, and the -1e30 entries never reach a matmul.
_NEG = -1.0e30


def _fused_kernel(xp_ref, colm_ref, bsrp_ref, negc_ref, pickrp_ref,
                  w1_ref, w2_ref, b1_ref, b2_ref,
                  o_ref,
                  pool_ref, v2p_ref,
                  *, cin, h1, w1n, h2, w2n, hp_rows):
    f32 = jnp.float32
    wp = xp_ref.shape[1]                      # padded input width (win + 2)

    # ---- Stage 1: Conv2d(cin -> 1, k=3, stride=3, pad=1) -------------------
    # rowsum[i, w] = sum_{c, ki} xp[c, 3i + ki, w] * w1[c, ki, w % 3]
    # Row phase ki is selected by the stride-3 sublane read (xp rows 3i + ki
    # all have row-phase ki); column phase (w % 3) is selected by the
    # precomputed colm masks combined with the SMEM weight scalars.
    rowsum = jnp.zeros((h1, wp), f32)
    for c in range(cin):
        for ki in range(3):
            base = c * 9 + ki * 3
            rv = (w1_ref[base + 0] * colm_ref[0:1, :]
                  + w1_ref[base + 1] * colm_ref[1:2, :]
                  + w1_ref[base + 2] * colm_ref[2:3, :])              # (1, wp)
            rows = xp_ref[pl.ds(c * hp_rows + ki, h1, stride=3), :]   # (h1, wp)
            rowsum = rowsum + rows * rv

    # Lane-direction 3-wide block sum (stride-3 column aggregation) as ONE 0/1
    # matmul; the constant also emits the two pool pad columns (zeros there),
    # and negc turns them into -inf-like pad while adding the conv bias.
    v1p = (jnp.dot(rowsum, bsrp_ref[...], preferred_element_type=f32)
           + (negc_ref[...] + b1_ref[0]))                         # (h1, w1n+2)

    # ---- Stage 2: MaxPool2d(k=3, stride=3, pad=1) ---------------------------
    # Only the two pad rows are filled; the interior is written exactly once
    # (sublane offset 1, no lane offset).
    pool_ref[0:1, :] = jnp.full((1, w1n + 2), _NEG, f32)
    pool_ref[h1 + 1:h1 + 2, :] = jnp.full((1, w1n + 2), _NEG, f32)
    pool_ref[1:h1 + 1, :] = v1p
    # Row direction: pairwise max over three stride-3 sublane reads (no MXU).
    mrow = jnp.maximum(
        jnp.maximum(pool_ref[pl.ds(0, h2, stride=3), :],
                    pool_ref[pl.ds(1, h2, stride=3), :]),
        pool_ref[pl.ds(2, h2, stride=3), :])                      # (h2, w1n+2)
    # Column direction: pairwise max over shifted value slices, then ONE 0/1
    # pick matmul (the constant also emits the zero pad columns for conv-2).
    m = jnp.maximum(jnp.maximum(mrow[:, 0:w1n], mrow[:, 1:w1n + 1]),
                    mrow[:, 2:w1n + 2])                           # (h2, w1n)
    v2p = jnp.dot(m, pickrp_ref[...], preferred_element_type=f32)  # (h2, w2n+2)

    # ---- Stage 3: Conv2d(1 -> 1, k=3, stride=1, pad=1) + x * sigmoid(x) ----
    v2p_ref[0:1, :] = jnp.zeros((1, w2n + 2), f32)
    v2p_ref[h2 + 1:h2 + 2, :] = jnp.zeros((1, w2n + 2), f32)
    v2p_ref[1:h2 + 1, :] = v2p
    acc = jnp.zeros((h2, w2n), f32)
    for ki in range(3):
        for kj in range(3):
            acc = acc + w2_ref[ki * 3 + kj] * v2p_ref[ki:ki + h2, kj:kj + w2n]
    acc = acc + b2_ref[0]
    o_ref[0, 0, :, :] = acc * jax.nn.sigmoid(acc)


def forward(x, params):
    w1, b1, w2, b2 = params["w1"], params["b1"], params["w2"], params["b2"]
    n, cin, hin, win = x.shape
    assert n == 1
    # Conv(k=3, s=3, p=1) and Pool(k=3, s=3, p=1) output sizes.
    h1 = (hin + 2 - 3) // 3 + 1
    w1n = (win + 2 - 3) // 3 + 1
    h2 = (h1 + 2 - 3) // 3 + 1
    w2n = (w1n + 2 - 3) // 3 + 1
    # The stride-3 tricks (and the finite -1e30 pool padding) require the
    # stride-3 windows to exactly tile the padded maps, which also guarantees
    # every kept pooling window contains at least one real element.
    assert (hin + 2, win + 2) == (3 * h1, 3 * w1n)
    assert (h1 + 2, w1n + 2) == (3 * h2, 3 * w2n)
    hp_rows, wp = hin + 2, win + 2

    # --- Wrapper-side zero padding (review item 1); channels flattened into
    # the sublane axis so the in-kernel stride-3 reads stay 2-D.
    xp = jnp.pad(x[0].astype(jnp.float32), ((0, 0), (1, 1), (1, 1)))
    xp = xp.reshape(cin * hp_rows, wp)

    # --- Trace-time numpy constants (review item 2), passed as VMEM inputs.
    col = np.arange(wp)
    colm = np.stack([(col % 3 == k) for k in range(3)]).astype(np.float32)    # (3, wp)
    # Block-sum matrix with built-in pool pad columns (cols 0 and w1n+1 = 0).
    j1 = np.arange(w1n)
    bs = ((col[:, None] >= 3 * j1[None, :]) &
          (col[:, None] < 3 * j1[None, :] + 3)).astype(np.float32)            # (wp, w1n)
    bsrp = np.zeros((wp, w1n + 2), np.float32)
    bsrp[:, 1:1 + w1n] = bs
    # -inf-like values for the two pool pad columns (added together with b1).
    negc = np.zeros((1, w1n + 2), np.float32)
    negc[0, 0] = _NEG
    negc[0, w1n + 1] = _NEG
    # Column-pick matrix with built-in zero pad columns for conv-2.
    wv = np.arange(w1n)
    j2 = np.arange(w2n)
    pickrp = np.zeros((w1n, w2n + 2), np.float32)
    pickrp[:, 1:1 + w2n] = (wv[:, None] == 3 * j2[None, :]).astype(np.float32)

    kernel = functools.partial(
        _fused_kernel,
        cin=cin, h1=h1, w1n=w1n, h2=h2, w2n=w2n, hp_rows=hp_rows)

    vmem = pl.BlockSpec(memory_space=pltpu.MemorySpace.VMEM)
    smem = pl.BlockSpec(memory_space=pltpu.MemorySpace.SMEM)

    flops = int(2 * (cin * 3 * h1 * wp            # stage-1 VPU accumulation
                     + h1 * wp * (w1n + 2)        # stage-1 block-sum matmul
                     + h2 * w1n * (w2n + 2)       # stage-2 pick matmul
                     + 9 * h2 * w2n))             # stage-3 conv
    bytes_accessed = int(4 * (cin * hp_rows * wp + 3 * wp + wp * (w1n + 2)
                              + (w1n + 2) + w1n * (w2n + 2)
                              + 27 + 9 + 2 + h2 * w2n))

    return pl.pallas_call(
        kernel,
        out_shape=jax.ShapeDtypeStruct((1, 1, h2, w2n), jnp.float32),
        in_specs=[vmem, vmem, vmem, vmem, vmem, smem, smem, smem, smem],
        out_specs=vmem,
        scratch_shapes=[
            pltpu.VMEM((h1 + 2, w1n + 2), jnp.float32),   # padded v1 (pool in)
            pltpu.VMEM((h2 + 2, w2n + 2), jnp.float32),   # padded v2 (conv-2 in)
        ],
        cost_estimate=pl.CostEstimate(
            flops=flops, transcendentals=int(h2 * w2n),
            bytes_accessed=bytes_accessed),
    )(xp,
      jnp.asarray(colm), jnp.asarray(bsrp), jnp.asarray(negc),
      jnp.asarray(pickrp),
      w1.reshape(-1).astype(jnp.float32),
      w2.reshape(-1).astype(jnp.float32),
      b1.reshape(-1).astype(jnp.float32),
      b2.reshape(-1).astype(jnp.float32))


def _reference(x, params):
    # Plain-JAX reference for the sanity check.
    w1, b1, w2, b2 = params["w1"], params["b1"], params["w2"], params["b2"]
    dn = ("NCHW", "OIHW", "NCHW")
    v1 = jax.lax.conv_general_dilated(
        x, w1, window_strides=(3, 3), padding=((1, 1), (1, 1)),
        dimension_numbers=dn) + b1.reshape(1, -1, 1, 1)
    v2 = jax.lax.reduce_window(
        v1, -jnp.inf, jax.lax.max, (1, 1, 3, 3), (1, 1, 3, 3),
        padding=((0, 0), (0, 0), (1, 1), (1, 1)))
    v3 = jax.lax.conv_general_dilated(
        v2, w2, window_strides=(1, 1), padding=((1, 1), (1, 1)),
        dimension_numbers=dn) + b2.reshape(1, -1, 1, 1)
    return v3 * jax.nn.sigmoid(v3)


if __name__ == "__main__":
    key = jax.random.PRNGKey(0)
    kx, k1, k2, k3, k4 = jax.random.split(key, 5)

    x1 = jax.random.normal(kx, (1, 3, 64, 64), dtype=jnp.float32)
    params = {
        # Conv2d(3, 1, 3): weight (out=1, in=3, kh=3, kw=3), bias (1,)
        "w1": jax.random.normal(k1, (1, 3, 3, 3), dtype=jnp.float32) * 0.1,
        "b1": jax.random.normal(k2, (1,), dtype=jnp.float32) * 0.1,
        # Conv2d(1, 1, 3): weight (1, 1, 3, 3), bias (1,)
        "w2": jax.random.normal(k3, (1, 1, 3, 3), dtype=jnp.float32) * 0.1,
        "b2": jax.random.normal(k4, (1,), dtype=jnp.float32) * 0.1,
    }

    fwd = jax.jit(forward)
    out = fwd(x1, params)
    jax.block_until_ready(out)
    assert out.shape == (1, 1, 8, 8) and out.dtype == jnp.float32

    ref = _reference(x1, params)
    err = float(jnp.max(jnp.abs(out - ref)))
    assert err < 1e-4, f"numerical mismatch vs reference: max abs err {err}"

    print("KERNEL_OK")
</pallas_src>

<mosaic_0001>
module attributes {stable_mosaic.version = 11 : i64} {
  func.func @_fused_kernel(%arg0: memref<198x66xf32, #tpu.memory_space<vmem>>, %arg1: memref<3x66xf32, #tpu.memory_space<vmem>>, %arg2: memref<66x24xf32, #tpu.memory_space<vmem>>, %arg3: memref<1x24xf32, #tpu.memory_space<vmem>>, %arg4: memref<22x10xf32, #tpu.memory_space<vmem>>, %arg5: memref<27xf32, #tpu.memory_space<smem>>, %arg6: memref<9xf32, #tpu.memory_space<smem>>, %arg7: memref<1xf32, #tpu.memory_space<smem>>, %arg8: memref<1xf32, #tpu.memory_space<smem>>, %arg9: memref<1x1x8x8xf32, #tpu.memory_space<vmem>>, %arg10: memref<24x24xf32, #tpu.memory_space<vmem>>, %arg11: memref<10x10xf32, #tpu.memory_space<vmem>>) attributes {dimension_semantics = [], scalar_prefetch = 0 : i64, scratch_operands = 2 : i64, tpu.core_type = #tpu.core_type<tc>} {
    %cst = arith.constant 0.000000e+00 : f32
    %0 = vector.broadcast %cst : f32 to vector<22x66xf32>
    %c0 = arith.constant 0 : index
    %1 = memref.load %arg5[%c0] : memref<27xf32, #tpu.memory_space<smem>>
    %c0_0 = arith.constant 0 : index
    %c0_1 = arith.constant 0 : index
    %2 = vector.load %arg1[%c0_0, %c0_1] : memref<3x66xf32, #tpu.memory_space<vmem>>, vector<1x66xf32>
    %3 = vector.broadcast %1 : f32 to vector<1x66xf32>
    %4 = arith.mulf %3, %2 : vector<1x66xf32>
    %c1 = arith.constant 1 : index
    %5 = memref.load %arg5[%c1] : memref<27xf32, #tpu.memory_space<smem>>
    %c1_2 = arith.constant 1 : index
    %c0_3 = arith.constant 0 : index
    %6 = vector.load %arg1[%c1_2, %c0_3] : memref<3x66xf32, #tpu.memory_space<vmem>>, vector<1x66xf32>
    %7 = vector.broadcast %5 : f32 to vector<1x66xf32>
    %8 = arith.mulf %7, %6 : vector<1x66xf32>
    %9 = arith.addf %4, %8 : vector<1x66xf32>
    %c2 = arith.constant 2 : index
    %10 = memref.load %arg5[%c2] : memref<27xf32, #tpu.memory_space<smem>>
    %c2_4 = arith.constant 2 : index
    %c0_5 = arith.constant 0 : index
    %11 = vector.load %arg1[%c2_4, %c0_5] : memref<3x66xf32, #tpu.memory_space<vmem>>, vector<1x66xf32>
    %12 = vector.broadcast %10 : f32 to vector<1x66xf32>
    %13 = arith.mulf %12, %11 : vector<1x66xf32>
    %14 = arith.addf %9, %13 : vector<1x66xf32>
    %c0_6 = arith.constant 0 : index
    %c0_7 = arith.constant 0 : index
    %15 = tpu.strided_load %arg0[%c0_6, %c0_7] {strides = array<i32: 3, 1>} : memref<198x66xf32, #tpu.memory_space<vmem>>, vector<22x66xf32>
    %16 = vector.broadcast %14 : vector<1x66xf32> to vector<22x66xf32>
    %17 = arith.mulf %15, %16 : vector<22x66xf32>
    %18 = arith.addf %0, %17 : vector<22x66xf32>
    %c3 = arith.constant 3 : index
    %19 = memref.load %arg5[%c3] : memref<27xf32, #tpu.memory_space<smem>>
    %c0_8 = arith.constant 0 : index
    %c0_9 = arith.constant 0 : index
    %20 = vector.load %arg1[%c0_8, %c0_9] : memref<3x66xf32, #tpu.memory_space<vmem>>, vector<1x66xf32>
    %21 = vector.broadcast %19 : f32 to vector<1x66xf32>
    %22 = arith.mulf %21, %20 : vector<1x66xf32>
    %c4 = arith.constant 4 : index
    %23 = memref.load %arg5[%c4] : memref<27xf32, #tpu.memory_space<smem>>
    %c1_10 = arith.constant 1 : index
    %c0_11 = arith.constant 0 : index
    %24 = vector.load %arg1[%c1_10, %c0_11] : memref<3x66xf32, #tpu.memory_space<vmem>>, vector<1x66xf32>
    %25 = vector.broadcast %23 : f32 to vector<1x66xf32>
    %26 = arith.mulf %25, %24 : vector<1x66xf32>
    %27 = arith.addf %22, %26 : vector<1x66xf32>
    %c5 = arith.constant 5 : index
    %28 = memref.load %arg5[%c5] : memref<27xf32, #tpu.memory_space<smem>>
    %c2_12 = arith.constant 2 : index
    %c0_13 = arith.constant 0 : index
    %29 = vector.load %arg1[%c2_12, %c0_13] : memref<3x66xf32, #tpu.memory_space<vmem>>, vector<1x66xf32>
    %30 = vector.broadcast %28 : f32 to vector<1x66xf32>
    %31 = arith.mulf %30, %29 : vector<1x66xf32>
    %32 = arith.addf %27, %31 : vector<1x66xf32>
    %c1_14 = arith.constant 1 : index
    %c0_15 = arith.constant 0 : index
    %33 = tpu.strided_load %arg0[%c1_14, %c0_15] {strides = array<i32: 3, 1>} : memref<198x66xf32, #tpu.memory_space<vmem>>, vector<22x66xf32>
    %34 = vector.broadcast %32 : vector<1x66xf32> to vector<22x66xf32>
    %35 = arith.mulf %33, %34 : vector<22x66xf32>
    %36 = arith.addf %18, %35 : vector<22x66xf32>
    %c6 = arith.constant 6 : index
    %37 = memref.load %arg5[%c6] : memref<27xf32, #tpu.memory_space<smem>>
    %c0_16 = arith.constant 0 : index
    %c0_17 = arith.constant 0 : index
    %38 = vector.load %arg1[%c0_16, %c0_17] : memref<3x66xf32, #tpu.memory_space<vmem>>, vector<1x66xf32>
    %39 = vector.broadcast %37 : f32 to vector<1x66xf32>
    %40 = arith.mulf %39, %38 : vector<1x66xf32>
    %c7 = arith.constant 7 : index
    %41 = memref.load %arg5[%c7] : memref<27xf32, #tpu.memory_space<smem>>
    %c1_18 = arith.constant 1 : index
    %c0_19 = arith.constant 0 : index
    %42 = vector.load %arg1[%c1_18, %c0_19] : memref<3x66xf32, #tpu.memory_space<vmem>>, vector<1x66xf32>
    %43 = vector.broadcast %41 : f32 to vector<1x66xf32>
    %44 = arith.mulf %43, %42 : vector<1x66xf32>
    %45 = arith.addf %40, %44 : vector<1x66xf32>
    %c8 = arith.constant 8 : index
    %46 = memref.load %arg5[%c8] : memref<27xf32, #tpu.memory_space<smem>>
    %c2_20 = arith.constant 2 : index
    %c0_21 = arith.constant 0 : index
    %47 = vector.load %arg1[%c2_20, %c0_21] : memref<3x66xf32, #tpu.memory_space<vmem>>, vector<1x66xf32>
    %48 = vector.broadcast %46 : f32 to vector<1x66xf32>
    %49 = arith.mulf %48, %47 : vector<1x66xf32>
    %50 = arith.addf %45, %49 : vector<1x66xf32>
    %c2_22 = arith.constant 2 : index
    %c0_23 = arith.constant 0 : index
    %51 = tpu.strided_load %arg0[%c2_22, %c0_23] {strides = array<i32: 3, 1>} : memref<198x66xf32, #tpu.memory_space<vmem>>, vector<22x66xf32>
    %52 = vector.broadcast %50 : vector<1x66xf32> to vector<22x66xf32>
    %53 = arith.mulf %51, %52 : vector<22x66xf32>
    %54 = arith.addf %36, %53 : vector<22x66xf32>
    %c9 = arith.constant 9 : index
    %55 = memref.load %arg5[%c9] : memref<27xf32, #tpu.memory_space<smem>>
    %c0_24 = arith.constant 0 : index
    %c0_25 = arith.constant 0 : index
    %56 = vector.load %arg1[%c0_24, %c0_25] : memref<3x66xf32, #tpu.memory_space<vmem>>, vector<1x66xf32>
    %57 = vector.broadcast %55 : f32 to vector<1x66xf32>
    %58 = arith.mulf %57, %56 : vector<1x66xf32>
    %c10 = arith.constant 10 : index
    %59 = memref.load %arg5[%c10] : memref<27xf32, #tpu.memory_space<smem>>
    %c1_26 = arith.constant 1 : index
    %c0_27 = arith.constant 0 : index
    %60 = vector.load %arg1[%c1_26, %c0_27] : memref<3x66xf32, #tpu.memory_space<vmem>>, vector<1x66xf32>
    %61 = vector.broadcast %59 : f32 to vector<1x66xf32>
    %62 = arith.mulf %61, %60 : vector<1x66xf32>
    %63 = arith.addf %58, %62 : vector<1x66xf32>
    %c11 = arith.constant 11 : index
    %64 = memref.load %arg5[%c11] : memref<27xf32, #tpu.memory_space<smem>>
    %c2_28 = arith.constant 2 : index
    %c0_29 = arith.constant 0 : index
    %65 = vector.load %arg1[%c2_28, %c0_29] : memref<3x66xf32, #tpu.memory_space<vmem>>, vector<1x66xf32>
    %66 = vector.broadcast %64 : f32 to vector<1x66xf32>
    %67 = arith.mulf %66, %65 : vector<1x66xf32>
    %68 = arith.addf %63, %67 : vector<1x66xf32>
    %c66 = arith.constant 66 : index
    %c0_30 = arith.constant 0 : index
    %69 = tpu.strided_load %arg0[%c66, %c0_30] {strides = array<i32: 3, 1>} : memref<198x66xf32, #tpu.memory_space<vmem>>, vector<22x66xf32>
    %70 = vector.broadcast %68 : vector<1x66xf32> to vector<22x66xf32>
    %71 = arith.mulf %69, %70 : vector<22x66xf32>
    %72 = arith.addf %54, %71 : vector<22x66xf32>
    %c12 = arith.constant 12 : index
    %73 = memref.load %arg5[%c12] : memref<27xf32, #tpu.memory_space<smem>>
    %c0_31 = arith.constant 0 : index
    %c0_32 = arith.constant 0 : index
    %74 = vector.load %arg1[%c0_31, %c0_32] : memref<3x66xf32, #tpu.memory_space<vmem>>, vector<1x66xf32>
    %75 = vector.broadcast %73 : f32 to vector<1x66xf32>
    %76 = arith.mulf %75, %74 : vector<1x66xf32>
    %c13 = arith.constant 13 : index
    %77 = memref.load %arg5[%c13] : memref<27xf32, #tpu.memory_space<smem>>
    %c1_33 = arith.constant 1 : index
    %c0_34 = arith.constant 0 : index
    %78 = vector.load %arg1[%c1_33, %c0_34] : memref<3x66xf32, #tpu.memory_space<vmem>>, vector<1x66xf32>
    %79 = vector.broadcast %77 : f32 to vector<1x66xf32>
    %80 = arith.mulf %79, %78 : vector<1x66xf32>
    %81 = arith.addf %76, %80 : vector<1x66xf32>
    %c14 = arith.constant 14 : index
    %82 = memref.load %arg5[%c14] : memref<27xf32, #tpu.memory_space<smem>>
    %c2_35 = arith.constant 2 : index
    %c0_36 = arith.constant 0 : index
    %83 = vector.load %arg1[%c2_35, %c0_36] : memref<3x66xf32, #tpu.memory_space<vmem>>, vector<1x66xf32>
    %84 = vector.broadcast %82 : f32 to vector<1x66xf32>
    %85 = arith.mulf %84, %83 : vector<1x66xf32>
    %86 = arith.addf %81, %85 : vector<1x66xf32>
    %c67 = arith.constant 67 : index
    %c0_37 = arith.constant 0 : index
    %87 = tpu.strided_load %arg0[%c67, %c0_37] {strides = array<i32: 3, 1>} : memref<198x66xf32, #tpu.memory_space<vmem>>, vector<22x66xf32>
    %88 = vector.broadcast %86 : vector<1x66xf32> to vector<22x66xf32>
    %89 = arith.mulf %87, %88 : vector<22x66xf32>
    %90 = arith.addf %72, %89 : vector<22x66xf32>
    %c15 = arith.constant 15 : index
    %91 = memref.load %arg5[%c15] : memref<27xf32, #tpu.memory_space<smem>>
    %c0_38 = arith.constant 0 : index
    %c0_39 = arith.constant 0 : index
    %92 = vector.load %arg1[%c0_38, %c0_39] : memref<3x66xf32, #tpu.memory_space<vmem>>, vector<1x66xf32>
    %93 = vector.broadcast %91 : f32 to vector<1x66xf32>
    %94 = arith.mulf %93, %92 : vector<1x66xf32>
    %c16 = arith.constant 16 : index
    %95 = memref.load %arg5[%c16] : memref<27xf32, #tpu.memory_space<smem>>
    %c1_40 = arith.constant 1 : index
    %c0_41 = arith.constant 0 : index
    %96 = vector.load %arg1[%c1_40, %c0_41] : memref<3x66xf32, #tpu.memory_space<vmem>>, vector<1x66xf32>
    %97 = vector.broadcast %95 : f32 to vector<1x66xf32>
    %98 = arith.mulf %97, %96 : vector<1x66xf32>
    %99 = arith.addf %94, %98 : vector<1x66xf32>
    %c17 = arith.constant 17 : index
    %100 = memref.load %arg5[%c17] : memref<27xf32, #tpu.memory_space<smem>>
    %c2_42 = arith.constant 2 : index
    %c0_43 = arith.constant 0 : index
    %101 = vector.load %arg1[%c2_42, %c0_43] : memref<3x66xf32, #tpu.memory_space<vmem>>, vector<1x66xf32>
    %102 = vector.broadcast %100 : f32 to vector<1x66xf32>
    %103 = arith.mulf %102, %101 : vector<1x66xf32>
    %104 = arith.addf %99, %103 : vector<1x66xf32>
    %c68 = arith.constant 68 : index
    %c0_44 = arith.constant 0 : index
    %105 = tpu.strided_load %arg0[%c68, %c0_44] {strides = array<i32: 3, 1>} : memref<198x66xf32, #tpu.memory_space<vmem>>, vector<22x66xf32>
    %106 = vector.broadcast %104 : vector<1x66xf32> to vector<22x66xf32>
    %107 = arith.mulf %105, %106 : vector<22x66xf32>
    %108 = arith.addf %90, %107 : vector<22x66xf32>
    %c18 = arith.constant 18 : index
    %109 = memref.load %arg5[%c18] : memref<27xf32, #tpu.memory_space<smem>>
    %c0_45 = arith.constant 0 : index
    %c0_46 = arith.constant 0 : index
    %110 = vector.load %arg1[%c0_45, %c0_46] : memref<3x66xf32, #tpu.memory_space<vmem>>, vector<1x66xf32>
    %111 = vector.broadcast %109 : f32 to vector<1x66xf32>
    %112 = arith.mulf %111, %110 : vector<1x66xf32>
    %c19 = arith.constant 19 : index
    %113 = memref.load %arg5[%c19] : memref<27xf32, #tpu.memory_space<smem>>
    %c1_47 = arith.constant 1 : index
    %c0_48 = arith.constant 0 : index
    %114 = vector.load %arg1[%c1_47, %c0_48] : memref<3x66xf32, #tpu.memory_space<vmem>>, vector<1x66xf32>
    %115 = vector.broadcast %113 : f32 to vector<1x66xf32>
    %116 = arith.mulf %115, %114 : vector<1x66xf32>
    %117 = arith.addf %112, %116 : vector<1x66xf32>
    %c20 = arith.constant 20 : index
    %118 = memref.load %arg5[%c20] : memref<27xf32, #tpu.memory_space<smem>>
    %c2_49 = arith.constant 2 : index
    %c0_50 = arith.constant 0 : index
    %119 = vector.load %arg1[%c2_49, %c0_50] : memref<3x66xf32, #tpu.memory_space<vmem>>, vector<1x66xf32>
    %120 = vector.broadcast %118 : f32 to vector<1x66xf32>
    %121 = arith.mulf %120, %119 : vector<1x66xf32>
    %122 = arith.addf %117, %121 : vector<1x66xf32>
    %c132 = arith.constant 132 : index
    %c0_51 = arith.constant 0 : index
    %123 = tpu.strided_load %arg0[%c132, %c0_51] {strides = array<i32: 3, 1>} : memref<198x66xf32, #tpu.memory_space<vmem>>, vector<22x66xf32>
    %124 = vector.broadcast %122 : vector<1x66xf32> to vector<22x66xf32>
    %125 = arith.mulf %123, %124 : vector<22x66xf32>
    %126 = arith.addf %108, %125 : vector<22x66xf32>
    %c21 = arith.constant 21 : index
    %127 = memref.load %arg5[%c21] : memref<27xf32, #tpu.memory_space<smem>>
    %c0_52 = arith.constant 0 : index
    %c0_53 = arith.constant 0 : index
    %128 = vector.load %arg1[%c0_52, %c0_53] : memref<3x66xf32, #tpu.memory_space<vmem>>, vector<1x66xf32>
    %129 = vector.broadcast %127 : f32 to vector<1x66xf32>
    %130 = arith.mulf %129, %128 : vector<1x66xf32>
    %c22 = arith.constant 22 : index
    %131 = memref.load %arg5[%c22] : memref<27xf32, #tpu.memory_space<smem>>
    %c1_54 = arith.constant 1 : index
    %c0_55 = arith.constant 0 : index
    %132 = vector.load %arg1[%c1_54, %c0_55] : memref<3x66xf32, #tpu.memory_space<vmem>>, vector<1x66xf32>
    %133 = vector.broadcast %131 : f32 to vector<1x66xf32>
    %134 = arith.mulf %133, %132 : vector<1x66xf32>
    %135 = arith.addf %130, %134 : vector<1x66xf32>
    %c23 = arith.constant 23 : index
    %136 = memref.load %arg5[%c23] : memref<27xf32, #tpu.memory_space<smem>>
    %c2_56 = arith.constant 2 : index
    %c0_57 = arith.constant 0 : index
    %137 = vector.load %arg1[%c2_56, %c0_57] : memref<3x66xf32, #tpu.memory_space<vmem>>, vector<1x66xf32>
    %138 = vector.broadcast %136 : f32 to vector<1x66xf32>
    %139 = arith.mulf %138, %137 : vector<1x66xf32>
    %140 = arith.addf %135, %139 : vector<1x66xf32>
    %c133 = arith.constant 133 : index
    %c0_58 = arith.constant 0 : index
    %141 = tpu.strided_load %arg0[%c133, %c0_58] {strides = array<i32: 3, 1>} : memref<198x66xf32, #tpu.memory_space<vmem>>, vector<22x66xf32>
    %142 = vector.broadcast %140 : vector<1x66xf32> to vector<22x66xf32>
    %143 = arith.mulf %141, %142 : vector<22x66xf32>
    %144 = arith.addf %126, %143 : vector<22x66xf32>
    %c24 = arith.constant 24 : index
    %145 = memref.load %arg5[%c24] : memref<27xf32, #tpu.memory_space<smem>>
    %c0_59 = arith.constant 0 : index
    %c0_60 = arith.constant 0 : index
    %146 = vector.load %arg1[%c0_59, %c0_60] : memref<3x66xf32, #tpu.memory_space<vmem>>, vector<1x66xf32>
    %147 = vector.broadcast %145 : f32 to vector<1x66xf32>
    %148 = arith.mulf %147, %146 : vector<1x66xf32>
    %c25 = arith.constant 25 : index
    %149 = memref.load %arg5[%c25] : memref<27xf32, #tpu.memory_space<smem>>
    %c1_61 = arith.constant 1 : index
    %c0_62 = arith.constant 0 : index
    %150 = vector.load %arg1[%c1_61, %c0_62] : memref<3x66xf32, #tpu.memory_space<vmem>>, vector<1x66xf32>
    %151 = vector.broadcast %149 : f32 to vector<1x66xf32>
    %152 = arith.mulf %151, %150 : vector<1x66xf32>
    %153 = arith.addf %148, %152 : vector<1x66xf32>
    %c26 = arith.constant 26 : index
    %154 = memref.load %arg5[%c26] : memref<27xf32, #tpu.memory_space<smem>>
    %c2_63 = arith.constant 2 : index
    %c0_64 = arith.constant 0 : index
    %155 = vector.load %arg1[%c2_63, %c0_64] : memref<3x66xf32, #tpu.memory_space<vmem>>, vector<1x66xf32>
    %156 = vector.broadcast %154 : f32 to vector<1x66xf32>
    %157 = arith.mulf %156, %155 : vector<1x66xf32>
    %158 = arith.addf %153, %157 : vector<1x66xf32>
    %c134 = arith.constant 134 : index
    %c0_65 = arith.constant 0 : index
    %159 = tpu.strided_load %arg0[%c134, %c0_65] {strides = array<i32: 3, 1>} : memref<198x66xf32, #tpu.memory_space<vmem>>, vector<22x66xf32>
    %160 = vector.broadcast %158 : vector<1x66xf32> to vector<22x66xf32>
    %161 = arith.mulf %159, %160 : vector<22x66xf32>
    %162 = arith.addf %144, %161 : vector<22x66xf32>
    %c0_66 = arith.constant 0 : index
    %c0_67 = arith.constant 0 : index
    %163 = vector.load %arg2[%c0_66, %c0_67] : memref<66x24xf32, #tpu.memory_space<vmem>>, vector<66x24xf32>
    %cst_68 = arith.constant dense<0.000000e+00> : vector<22x24xf32>
    %164 = tpu.matmul %162, %163, %cst_68 {dimension_numbers = #tpu.dot_dimension_numbers<[1], [0], [0], [1], [0, 0, 1, 1], [], []>} : vector<22x66xf32>, vector<66x24xf32>, vector<22x24xf32> -> vector<22x24xf32>
    %c0_69 = arith.constant 0 : index
    %c0_70 = arith.constant 0 : index
    %165 = vector.load %arg3[%c0_69, %c0_70] : memref<1x24xf32, #tpu.memory_space<vmem>>, vector<1x24xf32>
    %c0_71 = arith.constant 0 : index
    %166 = memref.load %arg7[%c0_71] : memref<1xf32, #tpu.memory_space<smem>>
    %167 = vector.broadcast %166 : f32 to vector<1x24xf32>
    %168 = arith.addf %165, %167 : vector<1x24xf32>
    %169 = vector.broadcast %168 : vector<1x24xf32> to vector<22x24xf32>
    %170 = arith.addf %164, %169 : vector<22x24xf32>
    %cst_72 = arith.constant -1.000000e+30 : f32
    %171 = vector.broadcast %cst_72 : f32 to vector<1x24xf32>
    %c0_73 = arith.constant 0 : index
    %c0_74 = arith.constant 0 : index
    %172 = vector.load %arg10[%c0_73, %c0_74] : memref<24x24xf32, #tpu.memory_space<vmem>>, vector<1x24xf32>
    tpu.vector_store %arg10[%c0_73, %c0_74], %171 {strides = array<i32>} : memref<24x24xf32, #tpu.memory_space<vmem>>, vector<1x24xf32>,
    %cst_75 = arith.constant -1.000000e+30 : f32
    %173 = vector.broadcast %cst_75 : f32 to vector<1x24xf32>
    %c23_76 = arith.constant 23 : index
    %c0_77 = arith.constant 0 : index
    %174 = vector.load %arg10[%c23_76, %c0_77] : memref<24x24xf32, #tpu.memory_space<vmem>>, vector<1x24xf32>
    tpu.vector_store %arg10[%c23_76, %c0_77], %173 {strides = array<i32>} : memref<24x24xf32, #tpu.memory_space<vmem>>, vector<1x24xf32>,
    %c1_78 = arith.constant 1 : index
    %c0_79 = arith.constant 0 : index
    %175 = vector.load %arg10[%c1_78, %c0_79] : memref<24x24xf32, #tpu.memory_space<vmem>>, vector<22x24xf32>
    tpu.vector_store %arg10[%c1_78, %c0_79], %170 {strides = array<i32>} : memref<24x24xf32, #tpu.memory_space<vmem>>, vector<22x24xf32>,
    %c0_80 = arith.constant 0 : index
    %c0_81 = arith.constant 0 : index
    %176 = tpu.strided_load %arg10[%c0_80, %c0_81] {strides = array<i32: 3, 1>} : memref<24x24xf32, #tpu.memory_space<vmem>>, vector<8x24xf32>
    %c1_82 = arith.constant 1 : index
    %c0_83 = arith.constant 0 : index
    %177 = tpu.strided_load %arg10[%c1_82, %c0_83] {strides = array<i32: 3, 1>} : memref<24x24xf32, #tpu.memory_space<vmem>>, vector<8x24xf32>
    %178 = arith.maximumf %176, %177 : vector<8x24xf32>
    %c2_84 = arith.constant 2 : index
    %c0_85 = arith.constant 0 : index
    %179 = tpu.strided_load %arg10[%c2_84, %c0_85] {strides = array<i32: 3, 1>} : memref<24x24xf32, #tpu.memory_space<vmem>>, vector<8x24xf32>
    %180 = arith.maximumf %178, %179 : vector<8x24xf32>
    %181 = vector.extract_strided_slice %180 {offsets = [0, 0], sizes = [8, 22], strides = [1, 1]} : vector<8x24xf32> to vector<8x22xf32>
    %182 = vector.extract_strided_slice %180 {offsets = [0, 1], sizes = [8, 22], strides = [1, 1]} : vector<8x24xf32> to vector<8x22xf32>
    %183 = arith.maximumf %181, %182 : vector<8x22xf32>
    %184 = vector.extract_strided_slice %180 {offsets = [0, 2], sizes = [8, 22], strides = [1, 1]} : vector<8x24xf32> to vector<8x22xf32>
    %185 = arith.maximumf %183, %184 : vector<8x22xf32>
    %c0_86 = arith.constant 0 : index
    %c0_87 = arith.constant 0 : index
    %186 = vector.load %arg4[%c0_86, %c0_87] : memref<22x10xf32, #tpu.memory_space<vmem>>, vector<22x10xf32>
    %cst_88 = arith.constant dense<0.000000e+00> : vector<8x10xf32>
    %187 = tpu.matmul %185, %186, %cst_88 {dimension_numbers = #tpu.dot_dimension_numbers<[1], [0], [0], [1], [0, 0, 1, 1], [], []>} : vector<8x22xf32>, vector<22x10xf32>, vector<8x10xf32> -> vector<8x10xf32>
    %cst_89 = arith.constant 0.000000e+00 : f32
    %188 = vector.broadcast %cst_89 : f32 to vector<1x10xf32>
    %c0_90 = arith.constant 0 : index
    %c0_91 = arith.constant 0 : index
    %189 = vector.load %arg11[%c0_90, %c0_91] : memref<10x10xf32, #tpu.memory_space<vmem>>, vector<1x10xf32>
    tpu.vector_store %arg11[%c0_90, %c0_91], %188 {strides = array<i32>} : memref<10x10xf32, #tpu.memory_space<vmem>>, vector<1x10xf32>,
    %cst_92 = arith.constant 0.000000e+00 : f32
    %190 = vector.broadcast %cst_92 : f32 to vector<1x10xf32>
    %c9_93 = arith.constant 9 : index
    %c0_94 = arith.constant 0 : index
    %191 = vector.load %arg11[%c9_93, %c0_94] : memref<10x10xf32, #tpu.memory_space<vmem>>, vector<1x10xf32>
    tpu.vector_store %arg11[%c9_93, %c0_94], %190 {strides = array<i32>} : memref<10x10xf32, #tpu.memory_space<vmem>>, vector<1x10xf32>,
    %c1_95 = arith.constant 1 : index
    %c0_96 = arith.constant 0 : index
    %192 = vector.load %arg11[%c1_95, %c0_96] : memref<10x10xf32, #tpu.memory_space<vmem>>, vector<8x10xf32>
    tpu.vector_store %arg11[%c1_95, %c0_96], %187 {strides = array<i32>} : memref<10x10xf32, #tpu.memory_space<vmem>>, vector<8x10xf32>,
    %cst_97 = arith.constant 0.000000e+00 : f32
    %193 = vector.broadcast %cst_97 : f32 to vector<8x8xf32>
    %c0_98 = arith.constant 0 : index
    %194 = memref.load %arg6[%c0_98] : memref<9xf32, #tpu.memory_space<smem>>
    %c0_99 = arith.constant 0 : index
    %c0_100 = arith.constant 0 : index
    %195 = vector.load %arg11[%c0_99, %c0_100] : memref<10x10xf32, #tpu.memory_space<vmem>>, vector<8x8xf32>
    %196 = vector.broadcast %194 : f32 to vector<8x8xf32>
    %197 = arith.mulf %196, %195 : vector<8x8xf32>
    %198 = arith.addf %193, %197 : vector<8x8xf32>
    %c1_101 = arith.constant 1 : index
    %199 = memref.load %arg6[%c1_101] : memref<9xf32, #tpu.memory_space<smem>>
    %c0_102 = arith.constant 0 : index
    %c1_103 = arith.constant 1 : index
    %200 = vector.load %arg11[%c0_102, %c1_103] : memref<10x10xf32, #tpu.memory_space<vmem>>, vector<8x8xf32>
    %201 = vector.broadcast %199 : f32 to vector<8x8xf32>
    %202 = arith.mulf %201, %200 : vector<8x8xf32>
    %203 = arith.addf %198, %202 : vector<8x8xf32>
    %c2_104 = arith.constant 2 : index
    %204 = memref.load %arg6[%c2_104] : memref<9xf32, #tpu.memory_space<smem>>
    %c0_105 = arith.constant 0 : index
    %c2_106 = arith.constant 2 : index
    %205 = vector.load %arg11[%c0_105, %c2_106] : memref<10x10xf32, #tpu.memory_space<vmem>>, vector<8x8xf32>
    %206 = vector.broadcast %204 : f32 to vector<8x8xf32>
    %207 = arith.mulf %206, %205 : vector<8x8xf32>
    %208 = arith.addf %203, %207 : vector<8x8xf32>
    %c3_107 = arith.constant 3 : index
    %209 = memref.load %arg6[%c3_107] : memref<9xf32, #tpu.memory_space<smem>>
    %c1_108 = arith.constant 1 : index
    %c0_109 = arith.constant 0 : index
    %210 = vector.load %arg11[%c1_108, %c0_109] : memref<10x10xf32, #tpu.memory_space<vmem>>, vector<8x8xf32>
    %211 = vector.broadcast %209 : f32 to vector<8x8xf32>
    %212 = arith.mulf %211, %210 : vector<8x8xf32>
    %213 = arith.addf %208, %212 : vector<8x8xf32>
    %c4_110 = arith.constant 4 : index
    %214 = memref.load %arg6[%c4_110] : memref<9xf32, #tpu.memory_space<smem>>
    %c1_111 = arith.constant 1 : index
    %c1_112 = arith.constant 1 : index
    %215 = vector.load %arg11[%c1_111, %c1_112] : memref<10x10xf32, #tpu.memory_space<vmem>>, vector<8x8xf32>
    %216 = vector.broadcast %214 : f32 to vector<8x8xf32>
    %217 = arith.mulf %216, %215 : vector<8x8xf32>
    %218 = arith.addf %213, %217 : vector<8x8xf32>
    %c5_113 = arith.constant 5 : index
    %219 = memref.load %arg6[%c5_113] : memref<9xf32, #tpu.memory_space<smem>>
    %c1_114 = arith.constant 1 : index
    %c2_115 = arith.constant 2 : index
    %220 = vector.load %arg11[%c1_114, %c2_115] : memref<10x10xf32, #tpu.memory_space<vmem>>, vector<8x8xf32>
    %221 = vector.broadcast %219 : f32 to vector<8x8xf32>
    %222 = arith.mulf %221, %220 : vector<8x8xf32>
    %223 = arith.addf %218, %222 : vector<8x8xf32>
    %c6_116 = arith.constant 6 : index
    %224 = memref.load %arg6[%c6_116] : memref<9xf32, #tpu.memory_space<smem>>
    %c2_117 = arith.constant 2 : index
    %c0_118 = arith.constant 0 : index
    %225 = vector.load %arg11[%c2_117, %c0_118] : memref<10x10xf32, #tpu.memory_space<vmem>>, vector<8x8xf32>
    %226 = vector.broadcast %224 : f32 to vector<8x8xf32>
    %227 = arith.mulf %226, %225 : vector<8x8xf32>
    %228 = arith.addf %223, %227 : vector<8x8xf32>
    %c7_119 = arith.constant 7 : index
    %229 = memref.load %arg6[%c7_119] : memref<9xf32, #tpu.memory_space<smem>>
    %c2_120 = arith.constant 2 : index
    %c1_121 = arith.constant 1 : index
    %230 = vector.load %arg11[%c2_120, %c1_121] : memref<10x10xf32, #tpu.memory_space<vmem>>, vector<8x8xf32>
    %231 = vector.broadcast %229 : f32 to vector<8x8xf32>
    %232 = arith.mulf %231, %230 : vector<8x8xf32>
    %233 = arith.addf %228, %232 : vector<8x8xf32>
    %c8_122 = arith.constant 8 : index
    %234 = memref.load %arg6[%c8_122] : memref<9xf32, #tpu.memory_space<smem>>
    %c2_123 = arith.constant 2 : index
    %c2_124 = arith.constant 2 : index
    %235 = vector.load %arg11[%c2_123, %c2_124] : memref<10x10xf32, #tpu.memory_space<vmem>>, vector<8x8xf32>
    %236 = vector.broadcast %234 : f32 to vector<8x8xf32>
    %237 = arith.mulf %236, %235 : vector<8x8xf32>
    %238 = arith.addf %233, %237 : vector<8x8xf32>
    %c0_125 = arith.constant 0 : index
    %239 = memref.load %arg8[%c0_125] : memref<1xf32, #tpu.memory_space<smem>>
    %240 = vector.broadcast %239 : f32 to vector<8x8xf32>
    %241 = arith.addf %238, %240 : vector<8x8xf32>
    %242 = arith.negf %241 : vector<8x8xf32>
    %243 = math.exp %242 : vector<8x8xf32>
    %cst_126 = arith.constant 1.000000e+00 : f32
    %244 = vector.broadcast %cst_126 : f32 to vector<8x8xf32>
    %245 = arith.addf %244, %243 : vector<8x8xf32>
    %246 = arith.divf %244, %245 : vector<8x8xf32>
    %247 = arith.mulf %241, %246 : vector<8x8xf32>
    %c0_127 = arith.constant 0 : index
    %c0_128 = arith.constant 0 : index
    %c0_129 = arith.constant 0 : index
    %c0_130 = arith.constant 0 : index
    %248 = vector.load %arg9[%c0_127, %c0_128, %c0_129, %c0_130] : memref<1x1x8x8xf32, #tpu.memory_space<vmem>>, vector<1x1x8x8xf32>
    %249 = vector.shape_cast %248 : vector<1x1x8x8xf32> to vector<8x8xf32>
    %250 = vector.shape_cast %247 : vector<8x8xf32> to vector<1x1x8x8xf32>
    tpu.vector_store %arg9[%c0_127, %c0_128, %c0_129, %c0_130], %250 {strides = array<i32>} : memref<1x1x8x8xf32, #tpu.memory_space<vmem>>, vector<1x1x8x8xf32>,
    return
  }
}

</mosaic_0001>

<bundles_post_ra>
// kernel: forward.1
= control target key start
LH: loop header
LB: loop body
LE: loop exit
PB: predicated region body
PF: predicated region fallthrough
CT: control target
= control target key end

     0   :  { %16 = vsyncpa [#allocation8], 0  ;;  %s1169_s0 = inlined_call_operand.vmem [shape: f32[198,66], index: 0, kind: input, shape index: {}]   ;;  %s1170_s1 = inlined_call_operand.vmem [shape: f32[3,66], index: 1, kind: input, shape index: {}]   ;;  %s1171_s2 = inlined_call_operand.vmem [shape: f32[66,24], index: 2, kind: input, shape index: {}]   ;;  %s1172_s3 = inlined_call_operand.vmem [shape: f32[1,24], index: 3, kind: input, shape index: {}]   ;;  %s1173_s4 = inlined_call_operand.vmem [shape: f32[22,10], index: 4, kind: input, shape index: {}]   ;;  %s1174_s5 = inlined_call_operand.vmem [shape: f32[27], index: 5, kind: input, shape index: {}]   ;;  %s1175_s6 = inlined_call_operand.vmem [shape: f32[9], index: 6, kind: input, shape index: {}]   ;;  %s1176_s7 = inlined_call_operand.<no memory space> [shape: f32[1], index: 7, kind: input, shape index: {}]   ;;  %s1177_s8 = inlined_call_operand.<no memory space> [shape: f32[1], index: 8, kind: input, shape index: {}]   ;;  %s1178_s9 = inlined_call_operand.hbm [shape: f32[1,1,8,8], index: 9, kind: output, shape index: {}]  }
   0x1   :  { %17 = vsyncpa [#allocation10], 0 }
   0x2   :  { %18 = vsyncpa [#allocation7], 0  ;;  %s35_s11 = sshll.u32 %s1174_s5, 4  ;;  %s45_s14 = sshll.u32 %s1175_s6, 4  ;;  %s36_s11 = int_to_ptr.vmem [resolvable:$true] %s35_s11  ;;  %s46_s14 = int_to_ptr.vmem [resolvable:$true] %s45_s14 }
   0x3   :  { %s750_s15 = scalar_lea.vmem %s36_s11, 16  ;;  %p755_p1 = scmp.lt.s32.totalorder %s36_s11, %s36_s11 }
   0x4   :  { %p751_p0 = scmp.ne.s32.totalorder %s36_s11, %s750_s15  ;;  %p756_p2 = scmp.lt.s32.totalorder %s750_s15, %s750_s15 }
   0x6   :  { %p757_p3 = por %p756_p2, %p755_p1 }
   0x8   :  { %p758_p4 = pnand %p757_p3, %p751_p0 }
   0xa   :  { %761 = shalt.err (!%p758_p4)
}
   0xb   :  { %s800_s16 = smov [#allocation6]   ;;  %s762_s17 = scalar_lea.vmem %s46_s14, 16 }
   0xc   :  { %38 = dma.vmem_to_smem %s36_s11, 16, %s800_s16, [#allocation8]  }
   0xd   :  { %p763_p5 = scmp.ne.s32.totalorder %s46_s14, %s762_s17  ;;  %p767_p6 = scmp.lt.s32.totalorder %s46_s14, %s46_s14 }
   0xe   :  { %p768_p7 = scmp.lt.s32.totalorder %s762_s17, %s762_s17 }
  0x10   :  { %p769_p8 = por %p768_p7, %p767_p6 }
  0x12   :  { %p770_p9 = pnand %p769_p8, %p763_p5 }
  0x14   :  { %773 = shalt.err (!%p770_p9)
}
  0x15   :  { %s801_s5 = smov [#allocation9]  }
  0x16   :  { %48 = dma.vmem_to_smem %s46_s14, 16, %s801_s5, [#allocation10]  }
  0x17   :  { %794 = dma.done.wait [#allocation8], 16  }
  0x18   :  { %795 = vsyncadd [#allocation8], 4294967280 }
  0x19   :  { %796 = dma.done.wait [#allocation10], 16  }
  0x1a   :  { %797 = vsyncadd [#allocation10], 4294967280 }
  0x1b   :  { %59 = sfence }
  0x1c   :  { %v313_v0 = vld [vmem:[%s1171_s2 + $0x40] sm:$0x3]  ;;  %vm334_vm0 = vcmask 1041408   ;;  %v802_v1 = vmov 0.0   ;;  %v312_v2 = vld [vmem:[%s1171_s2 + $0x38] sm:$0xff]  ;;  %s60_s21 = sld [smem:[#allocation6]]  ;;  %v79_v4 = vlaneseq }
  0x1d   :  { %702 = vmatprep.subr.mxu0 %v802_v1  ;;  %729 = vmatprep.subr.mxu1 %v802_v1  ;;  %vm803_vm1 = vmmov 0   ;;  %s619_s22 = sld [smem:[#allocation6 + $0x1]]  ;;  %v311_v3 = vld [vmem:[%s1171_s2 + $0x30] sm:$0xff]  ;;  %v310_v5 = vld [vmem:[%s1171_s2 + $0x28] sm:$0xff]  ;;  %v887_v6 = vld [vmem:[%s1170_s1] sm:$0x1] }
  0x1e   :  { %703 = vmatpush3.msk.msra.mxu0 %vm334_vm0, %v313_v0  ;;  %720 = vmatprep.mubr.msk.f32.mxu0 %vm803_vm1, %v802_v1  ;;  %s620_s25 = sld [smem:[#allocation6 + $0x2]]  ;;  %v892_v7 = vld [vmem:[%s1170_s1 + $0x1] sm:$0x1]  ;;  %v903_v10 = vld [vmem:[%s1170_s1 + $0x2] sm:$0x1]  ;;  %v80_v11 = vshrl.u32 %v79_v4, 7 }
  0x1f   :  { %704 = vmatprep.subr.mxu0 %v802_v1  ;;  %735 = vmatprep.mubr.msk.f32.mxu1 %vm803_vm1, %v802_v1  ;;  %s623_s30 = sld [smem:[#allocation6 + $0x3]]  ;;  %v309_v8 = vld [vmem:[%s1171_s2 + $0x20] sm:$0xff]  ;;  %v308_v14 = vld [vmem:[%s1171_s2 + $0x18] sm:$0xff]  ;;  %v307_v18 = vld [vmem:[%s1171_s2 + $0x10] sm:$0xff]  ;;  %vm324_vm2 = vcmask 539648   ;;  %vm418_vm3 = vcmask 188416  }
  0x20   :  { %705 = vmatpush3.msra.mxu0 %v312_v2  ;;  %s894_s12 = sld [smem:[#allocation6 + $0x4]]  ;;  %v922_v20 = vsub.s32 0, %v80_v11  ;;  %v306_v24 = vld [vmem:[%s1171_s2 + $0x8] sm:$0xff]  ;;  %v305_v30 = vld [vmem:[%s1171_s2] sm:$0xff]  ;;  %vm421_vm4 = vcmask 195584   ;;  %vm424_vm5 = vcmask 193536  }
  0x21   :  { %706 = vmatprep.subr.mxu0 %v802_v1  ;;  %s625_s17 = sld [smem:[#allocation6 + $0x5]]  ;;  %v74_v31 = vld [vmem:[%s1169_s0] ss:$3 sm:$0xff]  ;;  %v621_v38 = vld [vmem:[%s1169_s0 + $0x18] ss:$3 sm:$0xff]  ;;  %vm449_vm6 = vcmask 1045504  }
  0x22   :  { %707 = vmatpush3.msra.mxu0 %v311_v3  ;;  %v62_v9 = vstv %s60_s21  ;;  %s906_s5 = sld [smem:[#allocation6 + $0x6]]  ;;  %v622_v42 = vld [vmem:[%s1169_s0 + $0x30] ss:$3 sm:$0x3f]  ;;  %v632_v58 = vld [vmem:[%s1169_s0 + $0x2] ss:$3 sm:$0xff] }
  0x23   :  { %708 = vmatprep.subr.mxu0 %v802_v1  ;;  %v63_v12 = vmul.f32 %v62_v9, %v887_v6  ;;  %v66_v13 = vstv %s619_s22  ;;  %s913_s1 = sld [smem:[#allocation6 + $0x7]]  ;;  %v626_v44 = vld [vmem:[%s1169_s0 + $0x1] ss:$3 sm:$0xff]  ;;  %v627_v52 = vld [vmem:[%s1169_s0 + $0x19] ss:$3 sm:$0xff]  ;;  %s806_s10 = smov 126  }
  0x24   :  { %709 = vmatpush3.msra.mxu0 %v310_v5  ;;  %v67_v15 = vmul.f32 %v66_v13, %v892_v7  ;;  %v71_v16 = vstv %s620_s25  ;;  %s916_s19 = sld [smem:[#allocation6 + $0x8]]  ;;  %v638_v11 = vld [vmem:[%s1169_s0 + $0x42] ss:$3 sm:$0xff]  ;;  %vm445_vm7 = vcmask 179200   ;;  %vm523_vm8 = vcmask 73728  }
  0x25   :  { %710 = vmatprep.subr.mxu0 %v802_v1  ;;  %v72_v17 = vmul.f32 %v71_v16, %v903_v10  ;;  %v90_v21 = vstv %s623_s30  ;;  %s924_s22 = sld [smem:[#allocation6 + $0x9]]  ;;  %s805_s30 = smov 127   ;;  %524 = vst.msk [vmem:[#allocation3] sm:$0x1] %vm523_vm8, %v802_v1  ;;  %525 = vst.msk [vmem:[#allocation3 + $0x9] sm:$0x1] %vm523_vm8, %v802_v1 }
  0x26   :  { %711 = vmatpush3.msra.mxu0 %v309_v8  ;;  %v68_v19 = vadd.f32 %v67_v15, %v63_v12  ;;  %v91_v22 = vmul.f32 %v90_v21, %v887_v6  ;;  %v93_v23 = vstv %s894_s12  ;;  %s928_s23 = sld [smem:[#allocation6 + $0xa]]  ;;  %vm526_vm9 = vcmask 80896  }
  0x27   :  { %712 = vmatprep.subr.mxu0 %v802_v1  ;;  %v94_v26 = vmul.f32 %v93_v23, %v892_v7  ;;  %v97_v27 = vstv %s625_s17  ;;  %s935_s26 = sld [smem:[#allocation6 + $0xb]]  ;;  %vm601_vm10 = vcmask 64512  }
  0x28   :  { %713 = vmatpush3.msra.mxu0 %v308_v14  ;;  %v73_v25 = vadd.f32 %v72_v17, %v68_v19  ;;  %v98_v28 = vmul.f32 %v97_v27, %v903_v10  ;;  %v117_v29 = vstv %s906_s5  ;;  %s939_s27 = sld [smem:[#allocation6 + $0xc]]  ;;  %v633_v19 = vld [vmem:[%s1169_s0 + $0x1a] ss:$3 sm:$0xff] }
  0x29   :  { %714 = vmatprep.subr.mxu0 %v802_v1  ;;  %v95_v33 = vadd.f32 %v94_v26, %v91_v22  ;;  %v118_v34 = vmul.f32 %v117_v29, %v887_v6  ;;  %v120_v35 = vstv %s913_s1  ;;  %s951_s11 = sld [smem:[#allocation6 + $0xd]]  ;;  %v644_v26 = vld [vmem:[%s1169_s0 + $0x43] ss:$3 sm:$0xff] }
  0x2a   :  { %715 = vmatpush3.msra.mxu0 %v307_v18  ;;  %v82_v32 = vrot.slane %v73_v25, %v922_v20  ;;  %v121_v36 = vmul.f32 %v120_v35, %v892_v7  ;;  %v124_v37 = vstv %s916_s19  ;;  %s955_s12 = sld [smem:[#allocation6 + $0xe]] }
  0x2b   :  { %716 = vmatprep.subr.mxu0 %v802_v1  ;;  %v99_v39 = vadd.f32 %v98_v28, %v95_v33  ;;  %v125_v40 = vmul.f32 %v124_v37, %v903_v10  ;;  %v144_v41 = vstv %s924_s22  ;;  %s963_s14 = sld [smem:[#allocation6 + $0xf]] }
  0x2c   :  { %717 = vmatpush3.msra.mxu0 %v306_v24  ;;  %v83_v43 = vmul.f32 %v82_v32, %v74_v31  ;;  %v122_v45 = vadd.f32 %v121_v36, %v118_v34  ;;  %v145_v46 = vmul.f32 %v144_v41, %v887_v6  ;;  %v147_v47 = vstv %s928_s23  ;;  %s973_s6 = sld [smem:[#allocation6 + $0x10]] }
  0x2d   :  { %718 = vmatprep.subr.mxu0 %v802_v1  ;;  %v976_v48 = vrot.slane %v99_v39, %v922_v20  ;;  %v148_v49 = vmul.f32 %v147_v47, %v892_v7  ;;  %v151_v50 = vstv %s935_s26  ;;  %s980_s18 = sld [smem:[#allocation6 + $0x11]]  ;;  %v84_v51 = vmul.f32 %v621_v38, %v82_v32  ;;  %v650_v39 = vld [vmem:[%s1169_s0 + $0x44] ss:$3 sm:$0xff]  ;;  %v639_v47 = vld [vmem:[%s1169_s0 + $0x5a] ss:$3 sm:$0xff] }
  0x2e   :  { %719 = vmatpush3.msra.mxu0 %v305_v30  ;;  %v126_v53 = vadd.f32 %v125_v40, %v122_v45  ;;  %v152_v54 = vmul.f32 %v151_v50, %v903_v10  ;;  %v171_v55 = vstv %s939_s27  ;;  %s987_s20 = sld [smem:[#allocation6 + $0x12]]  ;;  %v989_v56 = vmul.f32 %v622_v42, %v82_v32 }
  0x2f   :  { %v110_v57 = vmul.f32 %v626_v44, %v976_v48  ;;  %v149_v59 = vadd.f32 %v148_v49, %v145_v46  ;;  %v172_v60 = vmul.f32 %v171_v55, %v887_v6  ;;  %v174_v61 = vstv %s951_s11  ;;  %s997_s23 = sld [smem:[#allocation6 + $0x13]]  ;;  %v656_v55 = vld [vmem:[%s1169_s0 + $0x84] ss:$3 sm:$0xff] }
  0x30   :  { %v1000_v62 = vrot.slane %v126_v53, %v922_v20  ;;  %v175_v63 = vmul.f32 %v174_v61, %v892_v7  ;;  %v178_v0 = vstv %s955_s12  ;;  %s1004_s24 = sld [smem:[#allocation6 + $0x14]]  ;;  %v111_v2 = vmul.f32 %v627_v52, %v976_v48  ;;  %v645_v53 = vld [vmem:[%s1169_s0 + $0x5b] ss:$3 sm:$0xff] }
  0x31   :  { %v113_v3 = vadd.f32 %v110_v57, %v83_v43  ;;  %v153_v4 = vadd.f32 %v152_v54, %v149_v59  ;;  %v179_v5 = vmul.f32 %v178_v0, %v903_v10  ;;  %v198_v8 = vstv %s963_s14  ;;  %s1009_s25 = sld [smem:[#allocation6 + $0x15]] }
  0x32   :  { %v137_v9 = vmul.f32 %v632_v58, %v1000_v62  ;;  %v176_v12 = vadd.f32 %v175_v63, %v172_v60  ;;  %v199_v13 = vmul.f32 %v198_v8, %v887_v6  ;;  %v201_v14 = vstv %s973_s6  ;;  %s1017_s28 = sld [smem:[#allocation6 + $0x16]]  ;;  %v651_v60 = vld [vmem:[%s1169_s0 + $0x5c] ss:$3 sm:$0xff] }
  0x33   :  { %v1020_v15 = vrot.slane %v153_v4, %v922_v20  ;;  %v202_v16 = vmul.f32 %v201_v14, %v892_v7  ;;  %v205_v17 = vstv %s980_s18  ;;  %s1024_s29 = sld [smem:[#allocation6 + $0x17]]  ;;  %v114_v18 = vadd.f32 %v111_v2, %v84_v51  ;;  %s807_s18 = smov [#allocation11]  }
  0x34   :  { %v140_v21 = vadd.f32 %v137_v9, %v113_v3  ;;  %v180_v22 = vadd.f32 %v179_v5, %v176_v12  ;;  %v206_v23 = vmul.f32 %v205_v17, %v903_v10  ;;  %v225_v24 = vstv %s987_s20  ;;  %s1031_s11 = sld [smem:[#allocation6 + $0x18]]  ;;  %v628_v3 = vld [vmem:[%s1169_s0 + $0x31] ss:$3 sm:$0x3f]  ;;  %s609_s1 = sshll.u32 %s807_s18, 4  ;;  %s610_s1 = int_to_ptr.vmem [resolvable:$true] %s609_s1 }
  0x35   :  { %v164_v25 = vmul.f32 %v638_v11, %v1020_v15  ;;  %v203_v27 = vadd.f32 %v202_v16, %v199_v13  ;;  %v226_v28 = vmul.f32 %v225_v24, %v887_v6  ;;  %v228_v29 = vstv %s997_s23  ;;  %s1039_s13 = sld [smem:[#allocation6 + $0x19]]  ;;  %v662_v12 = vld [vmem:[%s1169_s0 + $0x85] ss:$3 sm:$0xff]  ;;  %v640_v17 = vld [vmem:[%s1169_s0 + $0x72] ss:$3 sm:$0x3f]  ;;  %p779_p11 = scmp.lt.s32.totalorder %s610_s1, %s610_s1 }
  0x36   :  { %v1042_v30 = vrot.slane %v180_v22, %v922_v20  ;;  %v229_v31 = vmul.f32 %v228_v29, %v892_v7  ;;  %v232_v32 = vstv %s1004_s24  ;;  %s1046_s14 = sld [smem:[#allocation6 + $0x1a]]  ;;  %v138_v33 = vmul.f32 %v633_v19, %v1000_v62  ;;  %v669_v29 = vld [vmem:[%s1169_s0 + $0x9e] ss:$3 sm:$0xff]  ;;  %s774_s19 = scalar_lea.vmem %s610_s1, 128 }
  0x37   :  { %v167_v34 = vadd.f32 %v164_v25, %v140_v21  ;;  %v207_v35 = vadd.f32 %v206_v23, %v203_v27  ;;  %v233_v36 = vmul.f32 %v232_v32, %v903_v10  ;;  %v252_v37 = vstv %s1009_s25  ;;  %s683_s12 = sld [smem:[#allocation9 + $0x7]]  ;;  %p775_p10 = scmp.ne.s32.totalorder %s610_s1, %s774_s19 }
  0x38   :  { %v191_v38 = vmul.f32 %v644_v26, %v1042_v30  ;;  %v230_v40 = vadd.f32 %v229_v31, %v226_v28  ;;  %v253_v41 = vmul.f32 %v252_v37, %v887_v6  ;;  %v255_v42 = vstv %s1017_s28  ;;  %v646_v26 = vld [vmem:[%s1169_s0 + $0x73] ss:$3 sm:$0x3f]  ;;  %v668_v28 = vld [vmem:[%s1169_s0 + $0x86] ss:$3 sm:$0xff]  ;;  %s678_s2 = sld [smem:[#allocation9 + $0x2]]  ;;  %p780_p12 = scmp.lt.s32.totalorder %s774_s19, %s774_s19 }
  0x39   :  { %v217_v43 = vrot.slane %v207_v35, %v922_v20  ;;  %v256_v44 = vmul.f32 %v255_v42, %v892_v7  ;;  %v259_v45 = vstv %s1024_s29  ;;  %v141_v46 = vadd.f32 %v138_v33, %v114_v18  ;;  %v663_v18 = vld [vmem:[%s1169_s0 + $0x9d] ss:$3 sm:$0xff]  ;;  %s528_s15 = sld [smem:[#allocation9]] }
  0x3a   :  { %v194_v49 = vadd.f32 %v191_v38, %v167_v34  ;;  %v234_v50 = vadd.f32 %v233_v36, %v230_v40  ;;  %v260_v51 = vmul.f32 %v259_v45, %v903_v10  ;;  %v279_v52 = vstv %s1031_s11  ;;  %v652_v34 = vld [vmem:[%s1169_s0 + $0x74] ss:$3 sm:$0x3f]  ;;  %v664_v45 = vld [vmem:[%s1169_s0 + $0xb5] ss:$3 sm:$0x3f]  ;;  %p781_p13 = por %p780_p12, %p779_p11 }
  0x3b   :  { %v218_v54 = vmul.f32 %v650_v39, %v217_v43  ;;  %v257_v57 = vadd.f32 %v256_v44, %v253_v41  ;;  %v280_v58 = vmul.f32 %v279_v52, %v887_v6  ;;  %v282_v59 = vstv %s1039_s13  ;;  %v634_v6 = vld [vmem:[%s1169_s0 + $0x32] ss:$3 sm:$0x3f]  ;;  %s677_s11 = sld [smem:[#allocation9 + $0x1]] }
  0x3c   :  { %v244_v61 = vrot.slane %v234_v50, %v922_v20  ;;  %v283_v63 = vmul.f32 %v282_v59, %v892_v7  ;;  %v286_v0 = vstv %s1046_s14  ;;  %v165_v2 = vmul.f32 %v639_v47, %v1020_v15  ;;  %v657_v7 = vld [vmem:[%s1169_s0 + $0x9c] ss:$3 sm:$0xff]  ;;  %s681_s13 = sld [smem:[#allocation9 + $0x5]]  ;;  %p782_p0 = pnand %p781_p13, %p775_p10 }
  0x3d   :  { %v221_v4 = vadd.f32 %v218_v54, %v194_v49  ;;  %v261_v5 = vadd.f32 %v260_v51, %v257_v57  ;;  %v287_v8 = vmul.f32 %v286_v0, %v903_v10  ;;  %v192_v9 = vmul.f32 %v645_v53, %v1042_v30  ;;  %v670_v49 = vld [vmem:[%s1169_s0 + $0xb6] ss:$3 sm:$0x3f]  ;;  %v314_v57 = vld [vmem:[%s1172_s3] sm:$0x1]  ;;  %s684_s14 = sld [smem:[#allocation9 + $0x8]] }
  0x3e   :  { %v245_v11 = vmul.f32 %v656_v55, %v244_v61  ;;  %v284_v13 = vadd.f32 %v283_v63, %v280_v58  ;;  %v168_v14 = vadd.f32 %v165_v2, %v141_v46  ;;  %v219_v16 = vmul.f32 %v651_v60, %v217_v43  ;;  %s679_s16 = sld [smem:[#allocation9 + $0x3]] }
  0x3f   :  { %v271_v10 = vrot.slane %v261_v5, %v922_v20  ;;  %v112_v19 = vmul.f32 %v628_v3, %v976_v48  ;;  %v139_v21 = vmul.f32 %v634_v6, %v1000_v62  ;;  %v246_v25 = vmul.f32 %v657_v7, %v244_v61  ;;  %v442_v7 = vld [vmem:[%s1173_s4] sm:$0xff]  ;;  %s682_s17 = sld [smem:[#allocation9 + $0x6]] }
  0x40   :  { %v248_v22 = vadd.f32 %v245_v11, %v221_v4  ;;  %v288_v23 = vadd.f32 %v287_v8, %v284_v13  ;;  %v195_v24 = vadd.f32 %v192_v9, %v168_v14  ;;  %v166_v62 = vmul.f32 %v640_v17, %v1020_v15  ;;  %v444_v9 = vld [vmem:[%s1173_s4 + $0x10] sm:$0x3f] }
  0x41   :  { %v272_v27 = vmul.f32 %v662_v12, %v271_v10  ;;  %v115_v48 = vadd.f32 %v112_v19, %v989_v56  ;;  %v273_v33 = vmul.f32 %v663_v18, %v271_v10  ;;  %v193_v37 = vmul.f32 %v646_v26, %v1042_v30  ;;  %v658_v56 = vld [vmem:[%s1169_s0 + $0xb4] ss:$3 sm:$0x3f]  ;;  %730 = vmatpush3.msk.msra.mxu1 %vm449_vm6, %v444_v9 }
  0x42   :  { %v298_v31 = vrot.slane %v288_v23, %v922_v20  ;;  %v222_v32 = vadd.f32 %v219_v16, %v195_v24  ;;  %v220_v41 = vmul.f32 %v652_v34, %v217_v43  ;;  %v247_v47 = vmul.f32 %v658_v56, %v244_v61  ;;  %731 = vmatprep.subr.mxu1 %v802_v1 }
  0x43   :  { %v275_v35 = vadd.f32 %v272_v27, %v248_v22  ;;  %v142_v36 = vadd.f32 %v139_v21, %v115_v48  ;;  %v274_v43 = vmul.f32 %v664_v45, %v271_v10  ;;  %v804_v55 = vmov -1e+30  }
  0x44   :  { %v299_v38 = vmul.f32 %v668_v28, %v298_v31  ;;  %v249_v39 = vadd.f32 %v246_v25, %v222_v32  ;;  %v300_v40 = vmul.f32 %v669_v29, %v298_v31  ;;  %v301_v52 = vmul.f32 %v670_v49, %v298_v31  ;;  %419 = vst.msk [vmem:[#allocation2] sm:$0x1] %vm418_vm3, %v804_v55 }
  0x45   :  { %v169_v15 = vadd.f32 %v166_v62, %v142_v36  ;;  %420 = vst.msk [vmem:[#allocation2 + $0x17] sm:$0x1] %vm418_vm3, %v804_v55  ;;  %v316_v58 = vstv %s1176_s7  ;;  %v534_v24 = vstv %s677_s11  ;;  %v576_v48 = vstv %s683_s12 }
  0x46   :  { %v302_v42 = vadd.f32 %v299_v38, %v275_v35  ;;  %v276_v44 = vadd.f32 %v273_v33, %v249_v39  ;;  %v317_v59 = vadd.f32 %v316_v58, %v314_v57  ;;  %v542_v62 = vstv %s678_s2 }
  0x47   :  { %v196_v46 = vadd.f32 %v193_v37, %v169_v15  ;;  %v563_v32 = vstv %s681_s13  ;;  %v584_v34 = vstv %s684_s14  ;;  %v530_v36 = vstv %s528_s15 }
  0x48   :  { %721 = vmatmul.mubr.msk.f32.vlgmr.msra.gmra.mxu0 %vm324_vm2, %v302_v42  ;;  %v303_v30 = vadd.f32 %v300_v40, %v276_v44  ;;  %v322_v60 = vrot.slane %v317_v59, %v922_v20  ;;  %v443_v20 = vld [vmem:[%s1173_s4 + $0x8] sm:$0xff]  ;;  %s680_s4 = sld [smem:[#allocation9 + $0x4]]  ;;  %v551_v39 = vstv %s679_s16  ;;  %v572_v45 = vstv %s682_s17 }
  0x49   :  { %723 = vmatprep.mubr.msk.f32.mxu0 %vm803_vm1, %v802_v1  ;;  %v223_v50 = vadd.f32 %v220_v41, %v196_v46  ;;  %732 = vmatpush3.msra.mxu1 %v443_v20 }
  0x4a   :  { %733 = vmatprep.subr.mxu1 %v802_v1 }
  0x4b   :  { %v250_v51 = vadd.f32 %v247_v47, %v223_v50  ;;  %734 = vmatpush3.msra.mxu1 %v442_v7 }
  0x4c   :  { %724 = vmatmul.mubr.msk.f32.gmra.mxu0 %vm324_vm2, %v303_v30 }
  0x4d   :  { %726 = vmatprep.mubr.msk.f32.mxu0 %vm803_vm1, %v802_v1  ;;  %v277_v53 = vadd.f32 %v274_v43, %v250_v51 }
  0x4e   :  { %v555_v23 = vstv %s680_s4 }
  0x4f   :  { %v304_v54 = vadd.f32 %v301_v52, %v277_v53  ;;  %v592_v52 = vstv %s1177_s8 }
  0x51   :  { %727 = vmatmul.mubr.msk.f32.gmra.mxu0 %vm324_vm2, %v304_v54 }
 0x108   :  { %v404_v61 = vpop.f32.mrf.mxu0 }
 0x109   :  { %v405_v63 = vadd.f32 %v404_v61, %v322_v60 }
 0x10a   :  { %v722_v0 = vpop.f32.mrf.mxu0 }
 0x10b   :  { %422 = vst.msk [vmem:[#allocation2 + $0x1] sm:$0xff] %vm421_vm4, %v405_v63 }
 0x10c   :  { %v409_v2 = vpop.f32.mrf.mxu0 }
 0x10d   :  { %v410_v3 = vadd.f32 %v409_v2, %v322_v60 }
 0x10e   :  { %v725_v6 = vpop.f32.mrf.mxu0 }
 0x10f   :  { %423 = vst.msk [vmem:[#allocation2 + $0x9] sm:$0xff] %vm421_vm4, %v410_v3 }
 0x111   :  { %v414_v4 = vpop.f32.mrf.mxu0 }
 0x112   :  { %v415_v5 = vadd.f32 %v414_v4, %v322_v60 }
 0x113   :  { %v728_v8 = vpop.f32.mrf.mxu0 }
 0x114   :  { %425 = vst.msk [vmem:[#allocation2 + $0x11] sm:$0x3f] %vm424_vm5, %v415_v5 }
 0x11b   :  { %v426_v11 = vld [vmem:[#allocation2] ss:$3 sm:$0xff]  ;;  %v428_v12 = vld [vmem:[#allocation2 + $0x1] ss:$3 sm:$0xff]  ;;  %v431_v14 = vld [vmem:[#allocation2 + $0x2] ss:$3 sm:$0xff] }
 0x11c   :  { %v429_v13 = vmax.f32 %v426_v11, %v428_v12 }
 0x11e   :  { %v432_v16 = vmax.f32 %v429_v13, %v431_v14 }
 0x120   :  { %434 = vrot.lane.b32.xlu0 %v432_v16, %s805_s30 }
 0x124   :  { %438 = vrot.lane.b32.xlu0 %v432_v16, %s806_s10 }
 0x192   :  { %v435_v17 = vpop.permute.xlu0 %434 }
 0x193   :  { %v437_v10 = vmax.f32 %v432_v16, %v435_v17 }
 0x196   :  { %v439_v18 = vpop.permute.xlu0 %438 }
 0x197   :  { %v441_v19 = vmax.f32 %v437_v10, %v439_v18 }
 0x199   :  { %736 = vmatmul.mubr.msk.f32.vlgmr.msra.gmra.mxu1 %vm445_vm7, %v441_v19 }
 0x259   :  { %v519_v21 = vpop.f32.mrf.mxu1 }
 0x25a   :  { %527 = vst.msk [vmem:[#allocation3 + $0x1] sm:$0xff] %vm526_vm9, %v519_v21 }
 0x25b   :  { %v737_v22 = vpop.f32.mrf.mxu1 }
 0x261   :  { %v550_v25 = vld [vmem:[#allocation3 + $0x1] sm:$0xff] }
 0x262   :  { %v529_v26 = vld [vmem:[#allocation3] sm:$0xff]  ;;  %v556_v27 = vmul.f32 %v555_v23, %v550_v25  ;;  %v564_v33 = vmul.f32 %v563_v32, %v550_v25  ;;  %v552_v15 = vmul.f32 %v551_v39, %v550_v25 }
 0x263   :  { %v535_v28 = vmul.f32 %v534_v24, %v529_v26  ;;  %v571_v29 = vld [vmem:[#allocation3 + $0x2] sm:$0xff]  ;;  %v543_v31 = vmul.f32 %v542_v62, %v529_v26  ;;  %v531_v38 = vmul.f32 %v530_v36, %v529_v26 }
 0x264   :  { %558 = vrot.lane.b32.xlu0 %v556_v27, %s805_s30  ;;  %v577_v1 = vmul.f32 %v576_v48, %v571_v29  ;;  %v585_v35 = vmul.f32 %v584_v34, %v571_v29  ;;  %v573_v30 = vmul.f32 %v572_v45, %v571_v29 }
 0x265   :  { %537 = vrot.lane.b32.xlu1 %v535_v28, %s805_s30 }
 0x268   :  { %579 = vrot.lane.b32.xlu0 %v577_v1, %s805_s30 }
 0x269   :  { %545 = vrot.lane.b32.xlu1 %v543_v31, %s806_s10 }
 0x26d   :  { %566 = vrot.lane.b32.xlu1 %v564_v33, %s806_s10 }
 0x271   :  { %587 = vrot.lane.b32.xlu1 %v585_v35, %s806_s10 }
 0x2d6   :  { %v559_v44 = vpop.permute.xlu0 %558 }
 0x2d7   :  { %v538_v37 = vpop.permute.xlu1 %537 }
 0x2d8   :  { %v540_v40 = vadd.f32 %v538_v37, %v531_v38 }
 0x2da   :  { %v580_v43 = vpop.permute.xlu0 %579 }
 0x2db   :  { %v546_v56 = vpop.permute.xlu1 %545 }
 0x2dc   :  { %v548_v41 = vadd.f32 %v546_v56, %v540_v40 }
 0x2de   :  { %v553_v42 = vadd.f32 %v552_v15, %v548_v41 }
 0x2df   :  { %v567_v47 = vpop.permute.xlu1 %566 }
 0x2e0   :  { %v561_v46 = vadd.f32 %v559_v44, %v553_v42 }
 0x2e2   :  { %v569_v49 = vadd.f32 %v567_v47, %v561_v46 }
 0x2e3   :  { %v588_v53 = vpop.permute.xlu1 %587 }
 0x2e4   :  { %v574_v50 = vadd.f32 %v573_v30, %v569_v49 }
 0x2e6   :  { %v582_v51 = vadd.f32 %v580_v43, %v574_v50 }
 0x2e8   :  { %v590_v54 = vadd.f32 %v588_v53, %v582_v51 }
 0x2ea   :  { %v593_v55 = vadd.f32 %v592_v52, %v590_v54 }
 0x2ec   :  { %v685_v57 = vmul.f32 -1.442695, %v593_v55 }
 0x2ee   :  { %746 = vpow2.f32 %v685_v57 }
 0x2fb   :  { %v747_v58 = vpop.eup %746 }
 0x2fc   :  { %v597_v59 = vadd.f32 1.0, %v747_v58 }
 0x2fe   :  { %748 = vrcp.f32 %v597_v59 }
 0x30b   :  { %v749_v60 = vpop.eup %748 }
 0x30c   :  { %v600_v61 = vmul.f32 %v749_v60, %v593_v55 }
 0x30e   :  { %602 = vst.msk [vmem:[#allocation11] sm:$0xff] %vm601_vm10, %v600_v61 }
 0x30f   :  { %785 = shalt.err (!%p782_p0)
}
 0x310   :  { %612 = dma.vmem_to_hbm [thread:$0]  %s610_s1, 128, %s1178_s9, [#allocation7]  }
 0x311   :  { %798 = dma.done.wait [#allocation7], 128  }
 0x312   :  { %799 = vsyncadd [#allocation7], 4294967168 }
 0x313   :  { %616 = vsyncpa [#allocation7], 1 }
 0x314   :  { %617 = vsyncpa [#allocation8], 1 }
 0x315   :  { %618 = vsyncpa [#allocation10], 1 }

</bundles_post_ra>
